<compile_context>
chip_gen: v7x
topology: tpu7x:2x2x1
jax: 0.10.0
libtpu: 0.0.40
codegen_flags: <defaults>
</compile_context>

<pallas_src>
import functools
import math

import jax
import jax.numpy as jnp
from jax.experimental import pallas as pl
from jax.experimental.pallas import tpu as pltpu


LANE = 128      # lane width: pad hidden output dims to a multiple of this
SUBLANE = 8     # f32 sublane count: batch tiles are multiples of this


def _round_up(x, m):
    return ((x + m - 1) // m) * m


# ---------------------------------------------------------------------------
# Fused kernel: whole MLP in one body.  refs = (x, W_0..W_{L-1}, b_0..b_{L-1}, out)
# ---------------------------------------------------------------------------
def _fused_mlp_kernel(*refs, n_layers: int):
    x_ref = refs[0]
    w_refs = refs[1: 1 + n_layers]
    b_refs = refs[1 + n_layers: 1 + 2 * n_layers]
    o_ref = refs[1 + 2 * n_layers]

    h = x_ref[...].astype(jnp.float32)
    for i in range(n_layers):
        # y = h @ W_i + b_i  (MXU matmul, f32 accumulate; bias/activation in f32)
        y = jnp.dot(h, w_refs[i][...], preferred_element_type=jnp.float32)
        y = y + b_refs[i][...].astype(jnp.float32)
        if i != n_layers - 1:
            # SiLU(y) = y * sigmoid(y) = y / (1 + exp(-y)).
            # exp and the approximate reciprocal both go to the EUP slot.
            y = y * pl.reciprocal(1.0 + jnp.exp(-y), approx=True)
        # nn.Dropout in eval mode is identity.
        h = y
    o_ref[...] = h.astype(o_ref.dtype)


# ---------------------------------------------------------------------------
# Parameter init + one-time padding/prep
# ---------------------------------------------------------------------------
def init_mlp_params(key, layers):
    """Deterministic init mimicking nn.Linear default (U(-1/sqrt(fan_in), +1/sqrt(fan_in))).

    Weights stored as [n_in, n_out] (transpose of PyTorch's [n_out, n_in]) so the
    kernel computes y = x @ W + b directly on the MXU.
    """
    params = []
    for n_in, n_out in zip(layers[:-1], layers[1:]):
        key, kw, kb = jax.random.split(key, 3)
        bound = 1.0 / math.sqrt(n_in)
        w = jax.random.uniform(kw, (n_in, n_out), jnp.float32, -bound, bound)
        b = jax.random.uniform(kb, (n_out,), jnp.float32, -bound, bound)
        params.append((w, b))
    return params


def prep_mlp_params(params):
    """One-time prep: zero-pad hidden OUTPUT widths to multiples of 128.

    The input contraction dim of layer 0 and the final output width are kept at
    their true sizes (they equal the full array dims, so BlockSpec tiling rules
    are satisfied and no wrapper-side pad/slice of x / out is needed).
    Zero-padded rows/columns propagate exact zeros through matmul + SiLU, so the
    padded network computes identical values in its real columns.
    """
    n_layers = len(params)
    padded = []
    in_dim = params[0][0].shape[0]          # true (unpadded) input width
    for i, (w, b) in enumerate(params):
        n_in, n_out = w.shape
        p_in = in_dim                        # padded input width seen by this layer
        p_out = n_out if i == n_layers - 1 else _round_up(n_out, LANE)
        wp = jnp.zeros((p_in, p_out), w.dtype).at[:n_in, :n_out].set(w)
        bp = jnp.zeros((1, p_out), b.dtype).at[0, :n_out].set(b)
        padded.append((wp, bp))
        in_dim = p_out
    return padded


# ---------------------------------------------------------------------------
# Fused forward
# ---------------------------------------------------------------------------
def mlp_forward_fused(padded_params, x):
    """Replicates MLP.forward: (Linear -> SiLU -> Dropout)* ... Linear, in ONE pallas_call."""
    batch = x.shape[0]
    n_layers = len(padded_params)
    n_in = padded_params[0][0].shape[0]          # true input width (unpadded)
    n_out_final = padded_params[-1][0].shape[1]  # true output width (unpadded)
    assert x.shape[1] == n_in

    # --- batch tiling -------------------------------------------------------
    kind = (getattr(jax.devices()[0], "device_kind", "") or "").lower()
    num_tc = 2 if "v7" in kind else 1            # v7x has 2 TensorCores per chip
    tb = min(512, _round_up(batch, SUBLANE))     # big tiles: per-step overhead ~0.35us
    if num_tc > 1:
        # Ensure >= num_tc "parallel" grid steps whenever the batch allows,
        # otherwise one TC sits idle on v7x.
        tb = min(tb, max(SUBLANE, _round_up(-(-batch // num_tc), SUBLANE)))
    batch_p = _round_up(batch, tb)

    # Pad rows only if the batch is not tile-aligned (zero rows are inert).
    x_in = x if batch_p == batch else (
        jnp.zeros((batch_p, n_in), x.dtype).at[:batch, :].set(x))

    grid = (batch_p // tb,)

    in_specs = [pl.BlockSpec((tb, n_in), lambda i: (i, 0))]
    for w, _ in padded_params:
        ki, ko = w.shape
        in_specs.append(pl.BlockSpec((ki, ko), lambda i: (0, 0)))
    for _, b in padded_params:
        in_specs.append(pl.BlockSpec((1, b.shape[1]), lambda i: (0, 0)))
    out_specs = pl.BlockSpec((tb, n_out_final), lambda i: (i, 0))

    # --- advisory cost estimate ----------------------------------------------
    flops = 0
    transcendentals = 0
    bytes_accessed = batch_p * (n_in + n_out_final) * 4
    for i, (w, b) in enumerate(padded_params):
        ki, ko = w.shape
        flops += 2 * batch_p * ki * ko
        bytes_accessed += (w.size + b.size) * 4
        if i != n_layers - 1:
            transcendentals += 2 * batch_p * ko   # exp + reciprocal per SiLU element
    cost = pl.CostEstimate(flops=flops, transcendentals=transcendentals,
                           bytes_accessed=bytes_accessed)

    kernel = functools.partial(_fused_mlp_kernel, n_layers=n_layers)

    out = pl.pallas_call(
        kernel,
        out_shape=jax.ShapeDtypeStruct((batch_p, n_out_final), x.dtype),
        grid=grid,
        in_specs=in_specs,
        out_specs=out_specs,
        compiler_params=pltpu.CompilerParams(
            dimension_semantics=("parallel",),   # shards batch tiles across TCs (v7x)
            vmem_limit_bytes=32 * 1024 * 1024,
        ),
        cost_estimate=cost,
    )(x_in, *[w for w, _ in padded_params], *[b for _, b in padded_params])

    return out if batch_p == batch else out[:batch]


if __name__ == "__main__":
    # MLP(layers=[32, 64, 64, 16], dropout=0.1); dropout is identity at inference.
    layers = [32, 64, 64, 16]
    batch = 8

    key = jax.random.PRNGKey(0)
    key, kx = jax.random.split(key)
    x = jax.random.normal(kx, (batch, layers[0]), jnp.float32)

    params = init_mlp_params(key, layers)
    padded_params = prep_mlp_params(params)   # one-time prep, outside the forward path

    out = mlp_forward_fused(padded_params, x)
    out = jax.block_until_ready(out)

    # Sanity check against a pure-JAX reference (unpadded params).
    ref = x
    for i, (w, b) in enumerate(params):
        ref = ref @ w + b
        if i != len(params) - 1:
            ref = ref * jax.nn.sigmoid(ref)
    assert out.shape == (batch, layers[-1])
    # Tolerance relaxed vs exact f32 because SiLU uses the approximate EUP reciprocal.
    max_err = float(jnp.max(jnp.abs(out - ref)))
    assert jnp.allclose(out, ref, atol=1e-2, rtol=1e-2), f"max abs err {max_err}"

    print("KERNEL_OK")
</pallas_src>

<mosaic_0001>
module attributes {stable_mosaic.version = 11 : i64} {
  func.func @_fused_mlp_kernel(%arg0: i32, %arg1: memref<8x32xf32, #tpu.memory_space<vmem>>, %arg2: memref<32x128xf32, #tpu.memory_space<vmem>>, %arg3: memref<128x128xf32, #tpu.memory_space<vmem>>, %arg4: memref<128x16xf32, #tpu.memory_space<vmem>>, %arg5: memref<1x128xf32, #tpu.memory_space<vmem>>, %arg6: memref<1x128xf32, #tpu.memory_space<vmem>>, %arg7: memref<1x16xf32, #tpu.memory_space<vmem>>, %arg8: memref<8x16xf32, #tpu.memory_space<vmem>>) attributes {dimension_semantics = [#tpu.dimension_semantics<parallel>], iteration_bounds = array<i64: 1>, scalar_prefetch = 0 : i64, scratch_operands = 0 : i64, tpu.core_type = #tpu.core_type<tc>, window_params = [{transform_indices = @transform_0, window_bounds = array<i64: 8, 32>}, {pipeline_mode = #tpu.pipeline_mode<synchronous>, transform_indices = @transform_1, window_bounds = array<i64: 32, 128>}, {pipeline_mode = #tpu.pipeline_mode<synchronous>, transform_indices = @transform_2, window_bounds = array<i64: 128, 128>}, {pipeline_mode = #tpu.pipeline_mode<synchronous>, transform_indices = @transform_3, window_bounds = array<i64: 128, 16>}, {pipeline_mode = #tpu.pipeline_mode<synchronous>, transform_indices = @transform_4, window_bounds = array<i64: 1, 128>}, {pipeline_mode = #tpu.pipeline_mode<synchronous>, transform_indices = @transform_5, window_bounds = array<i64: 1, 128>}, {pipeline_mode = #tpu.pipeline_mode<synchronous>, transform_indices = @transform_6, window_bounds = array<i64: 1, 16>}, {transform_indices = @transform_7, window_bounds = array<i64: 8, 16>}]} {
    %c0 = arith.constant 0 : index
    %c0_0 = arith.constant 0 : index
    %0 = vector.load %arg1[%c0, %c0_0] : memref<8x32xf32, #tpu.memory_space<vmem>>, vector<8x32xf32>
    %c0_1 = arith.constant 0 : index
    %c0_2 = arith.constant 0 : index
    %1 = vector.load %arg2[%c0_1, %c0_2] : memref<32x128xf32, #tpu.memory_space<vmem>>, vector<32x128xf32>
    %cst = arith.constant dense<0.000000e+00> : vector<8x128xf32>
    %2 = tpu.matmul %0, %1, %cst {dimension_numbers = #tpu.dot_dimension_numbers<[1], [0], [0], [1], [0, 0, 1, 1], [], []>} : vector<8x32xf32>, vector<32x128xf32>, vector<8x128xf32> -> vector<8x128xf32>
    %c0_3 = arith.constant 0 : index
    %c0_4 = arith.constant 0 : index
    %3 = vector.load %arg5[%c0_3, %c0_4] : memref<1x128xf32, #tpu.memory_space<vmem>>, vector<1x128xf32>
    %4 = vector.broadcast %3 : vector<1x128xf32> to vector<8x128xf32>
    %5 = arith.addf %2, %4 : vector<8x128xf32>
    %cst_5 = arith.constant 0.000000e+00 : f32
    %6 = vector.broadcast %cst_5 : f32 to vector<8x128xf32>
    %7 = arith.subf %6, %5 : vector<8x128xf32>
    %8 = math.exp %7 : vector<8x128xf32>
    %cst_6 = arith.constant 1.000000e+00 : f32
    %9 = vector.broadcast %cst_6 : f32 to vector<8x128xf32>
    %10 = arith.addf %9, %8 : vector<8x128xf32>
    %11 = tpu.reciprocal %10 {approx = true} : vector<8x128xf32> -> vector<8x128xf32>
    %12 = arith.mulf %5, %11 : vector<8x128xf32>
    %c0_7 = arith.constant 0 : index
    %c0_8 = arith.constant 0 : index
    %13 = vector.load %arg3[%c0_7, %c0_8] : memref<128x128xf32, #tpu.memory_space<vmem>>, vector<128x128xf32>
    %cst_9 = arith.constant dense<0.000000e+00> : vector<8x128xf32>
    %14 = tpu.matmul %12, %13, %cst_9 {dimension_numbers = #tpu.dot_dimension_numbers<[1], [0], [0], [1], [0, 0, 1, 1], [], []>} : vector<8x128xf32>, vector<128x128xf32>, vector<8x128xf32> -> vector<8x128xf32>
    %c0_10 = arith.constant 0 : index
    %c0_11 = arith.constant 0 : index
    %15 = vector.load %arg6[%c0_10, %c0_11] : memref<1x128xf32, #tpu.memory_space<vmem>>, vector<1x128xf32>
    %16 = vector.broadcast %15 : vector<1x128xf32> to vector<8x128xf32>
    %17 = arith.addf %14, %16 : vector<8x128xf32>
    %cst_12 = arith.constant 0.000000e+00 : f32
    %18 = vector.broadcast %cst_12 : f32 to vector<8x128xf32>
    %19 = arith.subf %18, %17 : vector<8x128xf32>
    %20 = math.exp %19 : vector<8x128xf32>
    %cst_13 = arith.constant 1.000000e+00 : f32
    %21 = vector.broadcast %cst_13 : f32 to vector<8x128xf32>
    %22 = arith.addf %21, %20 : vector<8x128xf32>
    %23 = tpu.reciprocal %22 {approx = true} : vector<8x128xf32> -> vector<8x128xf32>
    %24 = arith.mulf %17, %23 : vector<8x128xf32>
    %c0_14 = arith.constant 0 : index
    %c0_15 = arith.constant 0 : index
    %25 = vector.load %arg4[%c0_14, %c0_15] : memref<128x16xf32, #tpu.memory_space<vmem>>, vector<128x16xf32>
    %cst_16 = arith.constant dense<0.000000e+00> : vector<8x16xf32>
    %26 = tpu.matmul %24, %25, %cst_16 {dimension_numbers = #tpu.dot_dimension_numbers<[1], [0], [0], [1], [0, 0, 1, 1], [], []>} : vector<8x128xf32>, vector<128x16xf32>, vector<8x16xf32> -> vector<8x16xf32>
    %c0_17 = arith.constant 0 : index
    %c0_18 = arith.constant 0 : index
    %27 = vector.load %arg7[%c0_17, %c0_18] : memref<1x16xf32, #tpu.memory_space<vmem>>, vector<1x16xf32>
    %28 = vector.broadcast %27 : vector<1x16xf32> to vector<8x16xf32>
    %29 = arith.addf %26, %28 : vector<8x16xf32>
    %c0_19 = arith.constant 0 : index
    %c0_20 = arith.constant 0 : index
    %30 = vector.load %arg8[%c0_19, %c0_20] : memref<8x16xf32, #tpu.memory_space<vmem>>, vector<8x16xf32>
    tpu.vector_store %arg8[%c0_19, %c0_20], %29 {strides = array<i32>} : memref<8x16xf32, #tpu.memory_space<vmem>>, vector<8x16xf32>,
    return
  }
  func.func @transform_0(%arg0: i32) -> (i32, i32) {
    %c0_i32 = arith.constant 0 : i32
    %c0_i32_0 = arith.constant 0 : i32
    return %arg0, %c0_i32 : i32, i32
  }
  func.func @transform_1(%arg0: i32) -> (i32, i32) {
    %c0_i32 = arith.constant 0 : i32
    %c0_i32_0 = arith.constant 0 : i32
    %c0_i32_1 = arith.constant 0 : i32
    return %c0_i32, %c0_i32_0 : i32, i32
  }
  func.func @transform_2(%arg0: i32) -> (i32, i32) {
    %c0_i32 = arith.constant 0 : i32
    %c0_i32_0 = arith.constant 0 : i32
    %c0_i32_1 = arith.constant 0 : i32
    return %c0_i32, %c0_i32_0 : i32, i32
  }
  func.func @transform_3(%arg0: i32) -> (i32, i32) {
    %c0_i32 = arith.constant 0 : i32
    %c0_i32_0 = arith.constant 0 : i32
    %c0_i32_1 = arith.constant 0 : i32
    return %c0_i32, %c0_i32_0 : i32, i32
  }
  func.func @transform_4(%arg0: i32) -> (i32, i32) {
    %c0_i32 = arith.constant 0 : i32
    %c0_i32_0 = arith.constant 0 : i32
    %c0_i32_1 = arith.constant 0 : i32
    return %c0_i32, %c0_i32_0 : i32, i32
  }
  func.func @transform_5(%arg0: i32) -> (i32, i32) {
    %c0_i32 = arith.constant 0 : i32
    %c0_i32_0 = arith.constant 0 : i32
    %c0_i32_1 = arith.constant 0 : i32
    return %c0_i32, %c0_i32_0 : i32, i32
  }
  func.func @transform_6(%arg0: i32) -> (i32, i32) {
    %c0_i32 = arith.constant 0 : i32
    %c0_i32_0 = arith.constant 0 : i32
    %c0_i32_1 = arith.constant 0 : i32
    return %c0_i32, %c0_i32_0 : i32, i32
  }
  func.func @transform_7(%arg0: i32) -> (i32, i32) {
    %c0_i32 = arith.constant 0 : i32
    %c0_i32_0 = arith.constant 0 : i32
    return %arg0, %c0_i32 : i32, i32
  }
}

</mosaic_0001>

<bundles_post_ra>
// kernel: tpu_custom_call.1
= control target key start
LH: loop header
LB: loop body
LE: loop exit
PB: predicated region body
PF: predicated region fallthrough
CT: control target
= control target key end

     0   :  { %12 = vsyncpa [#allocation3], 0  ;;  %s783_s0 = inlined_call_operand.vmem [shape: f32[8,32], index: 0, kind: input, shape index: {}]   ;;  %s784_s1 = inlined_call_operand.hbm [shape: f32[32,128], index: 1, kind: input, shape index: {}]   ;;  %s785_s2 = inlined_call_operand.vmem [shape: f32[128,128], index: 2, kind: input, shape index: {}]   ;;  %s786_s3 = inlined_call_operand.vmem [shape: f32[128,16], index: 3, kind: input, shape index: {}]   ;;  %s787_s4 = inlined_call_operand.vmem [shape: f32[1,128], index: 4, kind: input, shape index: {}]   ;;  %s788_s5 = inlined_call_operand.vmem [shape: f32[1,128], index: 5, kind: input, shape index: {}]   ;;  %s789_s6 = inlined_call_operand.vmem [shape: f32[1,16], index: 6, kind: input, shape index: {}]   ;;  %s790_s7 = inlined_call_operand.hbm [shape: f32[8,16], index: 7, kind: output, shape index: {}]  }
   0x1   :  { %13 = vsyncpa [#allocation4], 0  ;;  %s583_s24 = smov [#allocation2]   ;;  %s535_s28 = scalar_lea.hbm %s784_s1, 512 }
   0x2   :  { %s21_s25 = sshll.u32 %s583_s24, 4  ;;  %p536_p0 = scmp.ne.s32.totalorder %s784_s1, %s535_s28  ;;  %s22_s25 = int_to_ptr.vmem [resolvable:$true] %s21_s25 }
   0x3   :  { %p539_p1 = scmp.lt.u32.totalorder %s535_s28, %s784_s1 }
   0x5   :  { %p541_p2 = pnand %p539_p1, %p536_p0 }
   0x7   :  { %544 = shalt.err (!%p541_p2)
}
   0x8   :  { %s545_s10 = scalar_lea.vmem %s22_s25, 512  ;;  %p550_p4 = scmp.lt.s32.totalorder %s22_s25, %s22_s25 }
   0x9   :  { %p546_p3 = scmp.ne.s32.totalorder %s22_s25, %s545_s10  ;;  %p551_p5 = scmp.lt.s32.totalorder %s545_s10, %s545_s10 }
   0xb   :  { %p552_p6 = por %p551_p5, %p550_p4 }
   0xd   :  { %p553_p7 = pnand %p552_p6, %p546_p3 }
   0xf   :  { %556 = shalt.err (!%p553_p7)
}
  0x10   :  { %s584_s11 = smov 128   ;;  %s585_s12 = smov 8  }
  0x11   :  { %27 = dma.hbm_to_vmem [thread:$0]  %s784_s1, 512, %s22_s25, [#allocation3], %s584_s11, %s584_s11, %s585_s12  }
  0x12   :  { %579 = dma.done.wait [#allocation3], 512  }
  0x13   :  { %580 = vsyncadd [#allocation3], 4294966784  ;;  %v586_v0 = vmov 0.0|0.0   ;;  %vm587_vm0 = vmmov 0   ;;  %v588_v1 = vmov 0.0   ;;  %v42_v2 = vld [vmem:[#allocation2] sm:$0xff] }
  0x14   :  { %466 = vmatprep.subr.bf16.mxu0 %v586_v0  ;;  %393 = vmatprep.mubr.msk.f32.mxu0 %vm587_vm0, %v588_v1  ;;  %v43_v3 = vld [vmem:[#allocation2 + $0x8] sm:$0xff]  ;;  %v44_v4 = vld [vmem:[#allocation2 + $0x10] sm:$0xff]  ;;  %v45_v6 = vld [vmem:[#allocation2 + $0x18] sm:$0xff]  ;;  %vm53_vm1 = vcmask 261120   ;;  %s589_s30 = smov [#allocation5]   ;;  %vm325_vm2 = vcmask 130048  }
  0x15   :  { %472 = vmatprep.subr.bf16.mxu1 %v586_v0  ;;  %428 = vmatprep.mubr.msk.f32.mxu1 %vm587_vm0, %v588_v1  ;;  %v467_v5 = vpack.c.bf16 %v43_v3, %v42_v2  ;;  %v470_v7 = vpack.c.bf16 %v45_v6, %v44_v4  ;;  %v41_v8 = vld [vmem:[%s783_s0] sm:$0xff]  ;;  %v134_v10 = vld [vmem:[%s785_s2 + $0x8] sm:$0xff]  ;;  %v135_v12 = vld [vmem:[%s785_s2 + $0x10] sm:$0xff]  ;;  %s333_s8 = sshll.u32 %s589_s30, 4  ;;  %s334_s8 = int_to_ptr.vmem [resolvable:$true] %s333_s8 }
  0x16   :  { %v133_v9 = vld [vmem:[%s785_s2] sm:$0xff]  ;;  %v136_v13 = vld [vmem:[%s785_s2 + $0x18] sm:$0xff]  ;;  %v138_v16 = vld [vmem:[%s785_s2 + $0x28] sm:$0xff]  ;;  %p562_p9 = scmp.lt.s32.totalorder %s334_s8, %s334_s8 }
  0x17   :  { %468 = vmatpush3.bf16.msra.mxu0 %v467_v5  ;;  %v473_v11 = vpack.c.bf16 %v134_v10, %v133_v9  ;;  %v476_v14 = vpack.c.bf16 %v136_v13, %v135_v12  ;;  %v137_v15 = vld [vmem:[%s785_s2 + $0x20] sm:$0xff]  ;;  %v139_v18 = vld [vmem:[%s785_s2 + $0x30] sm:$0xff]  ;;  %v140_v19 = vld [vmem:[%s785_s2 + $0x38] sm:$0xff] }
  0x18   :  { %469 = vmatprep.subr.bf16.mxu0 %v586_v0  ;;  %v479_v17 = vpack.c.bf16 %v138_v16, %v137_v15  ;;  %v482_v20 = vpack.c.bf16 %v140_v19, %v139_v18  ;;  %v141_v21 = vld [vmem:[%s785_s2 + $0x40] sm:$0xff]  ;;  %v142_v22 = vld [vmem:[%s785_s2 + $0x48] sm:$0xff]  ;;  %v143_v24 = vld [vmem:[%s785_s2 + $0x50] sm:$0xff] }
  0x19   :  { %474 = vmatpush3.bf16.msra.mxu1 %v473_v11  ;;  %v485_v23 = vpack.c.bf16 %v142_v22, %v141_v21  ;;  %v144_v25 = vld [vmem:[%s785_s2 + $0x58] sm:$0xff]  ;;  %v145_v27 = vld [vmem:[%s785_s2 + $0x60] sm:$0xff]  ;;  %v146_v28 = vld [vmem:[%s785_s2 + $0x68] sm:$0xff] }
  0x1a   :  { %475 = vmatprep.subr.bf16.mxu1 %v586_v0  ;;  %v488_v26 = vpack.c.bf16 %v144_v25, %v143_v24  ;;  %v491_v29 = vpack.c.bf16 %v146_v28, %v145_v27  ;;  %v147_v30 = vld [vmem:[%s785_s2 + $0x70] sm:$0xff]  ;;  %v148_v31 = vld [vmem:[%s785_s2 + $0x78] sm:$0xff]  ;;  %v342_v33 = vld [vmem:[%s787_s4] ss:$0 sm:$0xff] }
  0x1b   :  { %471 = vmatpush3.bf16.msra.mxu0 %v470_v7  ;;  %v494_v32 = vpack.c.bf16 %v148_v31, %v147_v30  ;;  %v232_v43 = vld [vmem:[%s786_s3] sm:$0xff]  ;;  %v233_v44 = vld [vmem:[%s786_s3 + $0x8] sm:$0xff]  ;;  %v234_v46 = vld [vmem:[%s786_s3 + $0x10] sm:$0xff] }
  0x1c   :  { %496 = vmatprep.subr.bf16.mxu0 %v586_v0  ;;  %v497_v45 = vpack.c.bf16 %v233_v44, %v232_v43  ;;  %v235_v47 = vld [vmem:[%s786_s3 + $0x18] sm:$0xff]  ;;  %v236_v49 = vld [vmem:[%s786_s3 + $0x20] sm:$0xff]  ;;  %v237_v50 = vld [vmem:[%s786_s3 + $0x28] sm:$0xff] }
  0x1d   :  { %477 = vmatpush3.bf16.msra.mxu1 %v476_v14  ;;  %v500_v48 = vpack.c.bf16 %v235_v47, %v234_v46  ;;  %v503_v51 = vpack.c.bf16 %v237_v50, %v236_v49  ;;  %v238_v52 = vld [vmem:[%s786_s3 + $0x30] sm:$0xff]  ;;  %v239_v53 = vld [vmem:[%s786_s3 + $0x38] sm:$0xff]  ;;  %v240_v55 = vld [vmem:[%s786_s3 + $0x40] sm:$0xff] }
  0x1e   :  { %394 = vmatmul.mubr.msk.f32.vlgmr.msra.gmra.mrb[0].mxu0 %vm53_vm1, %v41_v8  ;;  %478 = vmatprep.subr.bf16.mxu1 %v586_v0  ;;  %v506_v54 = vpack.c.bf16 %v239_v53, %v238_v52  ;;  %v241_v56 = vld [vmem:[%s786_s3 + $0x48] sm:$0xff]  ;;  %v242_v58 = vld [vmem:[%s786_s3 + $0x50] sm:$0xff]  ;;  %v243_v59 = vld [vmem:[%s786_s3 + $0x58] sm:$0xff] }
  0x1f   :  { %463 = vmatprep.mubr.msk.f32.mxu0 %vm587_vm0, %v588_v1  ;;  %498 = vmatpush3.bf16.msra.mxu0 %v497_v45  ;;  %v509_v57 = vpack.c.bf16 %v241_v56, %v240_v55  ;;  %v512_v60 = vpack.c.bf16 %v243_v59, %v242_v58  ;;  %v244_v61 = vld [vmem:[%s786_s3 + $0x60] sm:$0xff]  ;;  %v245_v62 = vld [vmem:[%s786_s3 + $0x68] sm:$0xff]  ;;  %v246_v1 = vld [vmem:[%s786_s3 + $0x70] sm:$0xff] }
  0x20   :  { %499 = vmatprep.subr.bf16.mxu0 %v586_v0  ;;  %v515_v63 = vpack.c.bf16 %v245_v62, %v244_v61  ;;  %v247_v2 = vld [vmem:[%s786_s3 + $0x78] sm:$0xff]  ;;  %v344_v4 = vld [vmem:[%s788_s5] ss:$0 sm:$0xff]  ;;  %s557_s5 = scalar_lea.vmem %s334_s8, 128 }
  0x21   :  { %480 = vmatpush3.bf16.msra.mxu1 %v479_v17  ;;  %v518_v3 = vpack.c.bf16 %v247_v2, %v246_v1  ;;  %v345_v13 = vld [vmem:[%s789_s6] ss:$0 sm:$0xff]  ;;  %p558_p8 = scmp.ne.s32.totalorder %s334_s8, %s557_s5  ;;  %p563_p10 = scmp.lt.s32.totalorder %s557_s5, %s557_s5 }
  0x22   :  { %481 = vmatprep.subr.bf16.mxu1 %v586_v0 }
  0x23   :  { %501 = vmatpush3.bf16.msra.mxu0 %v500_v48  ;;  %p564_p11 = por %p563_p10, %p562_p9 }
  0x24   :  { %502 = vmatprep.subr.bf16.mxu0 %v586_v0 }
  0x25   :  { %483 = vmatpush3.bf16.msra.mxu1 %v482_v20  ;;  %p565_p12 = pnand %p564_p11, %p558_p8 }
  0x26   :  { %484 = vmatprep.subr.bf16.mxu1 %v586_v0 }
  0x27   :  { %504 = vmatpush3.bf16.msra.mxu0 %v503_v51 }
  0x28   :  { %505 = vmatprep.subr.bf16.mxu0 %v586_v0 }
  0x29   :  { %486 = vmatpush3.bf16.msra.mxu1 %v485_v23 }
  0x2a   :  { %487 = vmatprep.subr.bf16.mxu1 %v586_v0 }
  0x2b   :  { %507 = vmatpush3.bf16.msra.mxu0 %v506_v54 }
  0x2c   :  { %508 = vmatprep.subr.bf16.mxu0 %v586_v0 }
  0x2d   :  { %489 = vmatpush3.bf16.msra.mxu1 %v488_v26 }
  0x2e   :  { %490 = vmatprep.subr.bf16.mxu1 %v586_v0 }
  0x2f   :  { %510 = vmatpush3.bf16.msra.mxu0 %v509_v57 }
  0x30   :  { %511 = vmatprep.subr.bf16.mxu0 %v586_v0 }
  0x31   :  { %492 = vmatpush3.bf16.msra.mxu1 %v491_v29 }
  0x32   :  { %493 = vmatprep.subr.bf16.mxu1 %v586_v0 }
  0x33   :  { %513 = vmatpush3.bf16.msra.mxu0 %v512_v60 }
  0x34   :  { %514 = vmatprep.subr.bf16.mxu0 %v586_v0 }
  0x35   :  { %495 = vmatpush3.bf16.msra.mxu1 %v494_v32 }
  0x37   :  { %516 = vmatpush3.bf16.msra.mxu0 %v515_v63 }
  0x38   :  { %517 = vmatprep.subr.bf16.mxu0 %v586_v0 }
  0x3b   :  { %519 = vmatpush3.bf16.msra.mxu0 %v518_v3 }
  0xf1   :  { %v123_v34 = vpop.f32.mrb[0].mxu0 }
  0xf2   :  { %v124_v35 = vadd.f32 %v342_v33, %v123_v34  ;;  %v395_v36 = vpop.f32.mrb[1].mxu0 }
  0xf4   :  { %v127_v37 = vsub.f32 0.0, %v124_v35 }
  0xf6   :  { %v128_v38 = vmul.f32 1.442695, %v127_v37 }
  0xf8   :  { %527 = vpow2.f32 %v128_v38 }
 0x102   :  { %v528_v39 = vpop.eup %527 }
 0x103   :  { %v130_v40 = vadd.f32 1.0, %v528_v39 }
 0x105   :  { %529 = vrcp.f32 %v130_v40 }
 0x10f   :  { %v530_v41 = vpop.eup %529 }
 0x110   :  { %v132_v42 = vmul.f32 %v530_v41, %v124_v35 }
 0x112   :  { %429 = vmatmul.mubr.f32.vlgmr.msra.gmra.mrb[0].mxu1 %v132_v42 }
 0x1e5   :  { %v222_v5 = vpop.f32.mrb[0].mxu1 }
 0x1e6   :  { %v223_v6 = vadd.f32 %v344_v4, %v222_v5  ;;  %v430_v7 = vpop.f32.mrb[1].mxu1 }
 0x1e8   :  { %v226_v8 = vsub.f32 0.0, %v223_v6 }
 0x1ea   :  { %v227_v9 = vmul.f32 1.442695, %v226_v8 }
 0x1ec   :  { %531 = vpow2.f32 %v227_v9 }
 0x1f6   :  { %v532_v0 = vpop.eup %531 }
 0x1f7   :  { %v229_v10 = vadd.f32 1.0, %v532_v0 }
 0x1f9   :  { %533 = vrcp.f32 %v229_v10 }
 0x203   :  { %v534_v11 = vpop.eup %533 }
 0x204   :  { %v231_v12 = vmul.f32 %v534_v11, %v223_v6 }
 0x206   :  { %464 = vmatmul.mubr.f32.vlgmr.msra.gmra.mrb[2].mxu0 %v231_v12 }
 0x2d9   :  { %v321_v14 = vpop.f32.mrb[2].mxu0 }
 0x2da   :  { %v322_v15 = vadd.f32 %v345_v13, %v321_v14  ;;  %v465_v16 = vpop.f32.mrb[3].mxu0 }
 0x2dc   :  { %326 = vst.msk [vmem:[#allocation5] sm:$0xff] %vm325_vm2, %v322_v15 }
 0x2dd   :  { %568 = shalt.err (!%p565_p12)
}
 0x2de   :  { %s569_s11 = scalar_lea.hbm %s790_s7, 128 }
 0x2df   :  { %p570_p13 = scmp.ne.s32.totalorder %s790_s7, %s569_s11  ;;  %p573_p0 = scmp.lt.u32.totalorder %s569_s11, %s790_s7 }
 0x2e1   :  { %p575_p1 = pnand %p573_p0, %p570_p13 }
 0x2e3   :  { %578 = shalt.err (!%p575_p1)
}
 0x2e4   :  { %336 = dma.vmem_to_hbm [thread:$0]  %s334_s8, 128, %s790_s7, [#allocation4]  }
 0x2e5   :  { %581 = dma.done.wait [#allocation4], 128  }
 0x2e6   :  { %582 = vsyncadd [#allocation4], 4294967168 }
 0x2e7   :  { %340 = vsyncpa [#allocation3], 1 }
 0x2e8   :  { %341 = vsyncpa [#allocation4], 1 }

</bundles_post_ra>
